<compile_context>
chip_gen: v7x
topology: tpu7x:2x2x1
jax: 0.10.0
libtpu: 0.0.40
codegen_flags: <defaults>
</compile_context>

<pallas_src>
import jax
import jax.numpy as jnp
import numpy as np
from jax.experimental import pallas as pl
from jax.experimental.pallas import tpu as pltpu

# ------------------------- configuration (small test) -------------------------
PATCH = 14          # hardcoded in BasicTransformer
IMG = 28            # small img_size -> 2x2 = 4 patches
CHANNELS = 3        # Conv2d(3, embed_dim, ...)
EMBED_DIM = 128     # reduced from 768 ("base") for a small, lane-aligned test
BATCH = 2
GRID_HW = IMG // PATCH
NUM_PATCHES = GRID_HW * GRID_HW          # P
SEQ = NUM_PATCHES + 1                    # P + 1 (cls token)
K_DIM = CHANNELS * PATCH * PATCH         # im2col contraction dim = 588
LN_EPS = 1e-5                            # nn.LayerNorm default


def _round_up(v, m):
    return ((v + m - 1) // m) * m


K_PAD = _round_up(K_DIM, 128)                        # 640: clean full-width MXU passes
M_TOTAL = BATCH * NUM_PATCHES                        # B*P rows fed to the MXU
M_TILE = min(256, _round_up(M_TOTAL, 16))            # bf16 sublane-friendly M tile
M_PAD = _round_up(M_TOTAL, M_TILE)


# ------------------------------ Pallas kernels --------------------------------
def patch_embed_kernel(p_ref, w_ref, b_ref, o_ref):
    # p_ref: (M_TILE, K_PAD) bf16   w_ref: (K_PAD, D) bf16
    # b_ref: (1, D) f32             o_ref: (M_TILE, D) f32
    acc = jnp.dot(p_ref[...], w_ref[...], preferred_element_type=jnp.float32)
    o_ref[...] = acc + b_ref[...]


def cls_ln_kernel(cp_ref, g_ref, be_ref, o_ref):
    # cp_ref: (1, D) = cls_token + pos_embed[:, 0]; LayerNorm over D only.
    x = cp_ref[...]
    mean = jnp.mean(x, axis=-1, keepdims=True)
    xc = x - mean
    var = jnp.mean(xc * xc, axis=-1, keepdims=True)
    o_ref[...] = xc * jax.lax.rsqrt(var + LN_EPS) * g_ref[...] + be_ref[...]


def patch_embed_call(pm, w, bias):
    M, Kp = pm.shape
    D = w.shape[1]
    return pl.pallas_call(
        patch_embed_kernel,
        out_shape=jax.ShapeDtypeStruct((M, D), jnp.float32),
        grid=(M // M_TILE,),
        in_specs=[
            pl.BlockSpec((M_TILE, Kp), lambda i: (i, 0)),
            pl.BlockSpec((Kp, D), lambda i: (0, 0)),
            pl.BlockSpec((1, D), lambda i: (0, 0)),
        ],
        out_specs=pl.BlockSpec((M_TILE, D), lambda i: (i, 0)),
        compiler_params=pltpu.CompilerParams(
            dimension_semantics=("parallel",)),
    )(pm, w, bias)


def cls_ln_call(cls_pos0, gamma, beta):
    D = cls_pos0.shape[1]
    return pl.pallas_call(
        cls_ln_kernel,
        out_shape=jax.ShapeDtypeStruct((1, D), jnp.float32),
        grid=(1,),
        in_specs=[
            pl.BlockSpec((1, D), lambda i: (0, 0)),
            pl.BlockSpec((1, D), lambda i: (0, 0)),
            pl.BlockSpec((1, D), lambda i: (0, 0)),
        ],
        out_specs=pl.BlockSpec((1, D), lambda i: (0, 0)),
        compiler_params=pltpu.CompilerParams(
            dimension_semantics=("arbitrary",)),
    )(cls_pos0, gamma, beta)


# ------------------------------- module wrapper --------------------------------
def init_params(key):
    k1, k2, k3, k4 = jax.random.split(key, 4)
    return {
        # Conv2d(3, D, 14, 14): weight (D, C, p, p), bias (D,)
        "patch_w": jax.random.normal(k1, (EMBED_DIM, CHANNELS, PATCH, PATCH), jnp.float32) * 0.02,
        "patch_b": jax.random.normal(k2, (EMBED_DIM,), jnp.float32) * 0.02,
        "pos_embed": jax.random.normal(k3, (1, SEQ, EMBED_DIM), jnp.float32) * 0.02,
        "cls_token": jax.random.normal(k4, (1, 1, EMBED_DIM), jnp.float32) * 0.02,
        "ln_gamma": jnp.ones((EMBED_DIM,), jnp.float32),
        "ln_beta": jnp.zeros((EMBED_DIM,), jnp.float32),
    }


def pack_params(params):
    # One-time layout prep: (K, D) weight with K zero-padded to 640, bf16 for
    # the MXU; fused cls_token + pos_embed[:, 0] row for the CLS LayerNorm.
    w_kd = params["patch_w"].reshape(EMBED_DIM, K_DIM).T               # (K, D)
    w_kd = jnp.pad(w_kd, ((0, K_PAD - K_DIM), (0, 0))).astype(jnp.bfloat16)
    return {
        "w_kd": w_kd,                                                  # (K_PAD, D) bf16
        "bias": params["patch_b"].reshape(1, EMBED_DIM),               # (1, D) f32
        "cls_pos0": params["cls_token"][0] + params["pos_embed"][:, 0],  # (1, D) f32
        "gamma": params["ln_gamma"].reshape(1, EMBED_DIM),
        "beta": params["ln_beta"].reshape(1, EMBED_DIM),
    }


def im2col(x):
    # x: (B, C, H, W) NCHW -> (B, P, C*p*p), patch vector ordered (C, kh, kw)
    B, C, H, W = x.shape
    gh, gw = H // PATCH, W // PATCH
    x = x.reshape(B, C, gh, PATCH, gw, PATCH)
    x = x.transpose(0, 2, 4, 1, 3, 5)                # (B, gh, gw, C, p, p)
    return x.reshape(B, gh * gw, C * PATCH * PATCH)


def patch_embed(x, packed):
    # Conv2d(3, D, 14, 14) as one lane-aligned bf16 MXU matmul over B*P rows.
    B = x.shape[0]
    pf = im2col(x).reshape(B * NUM_PATCHES, K_DIM)
    pf = jnp.pad(pf, ((0, M_PAD - B * NUM_PATCHES), (0, K_PAD - K_DIM)))
    pf = pf.astype(jnp.bfloat16)
    emb = patch_embed_call(pf, packed["w_kd"], packed["bias"])         # (M_PAD, D)
    return emb[:B * NUM_PATCHES].reshape(B, NUM_PATCHES, EMBED_DIM)


def dinov2_backbone_forward(x, packed):
    # Module output: x[:, 0] after LayerNorm.  Row 0 of the token sequence is
    # cls_token + pos_embed[:, 0] (no mixing with patch embeddings before the
    # LayerNorm in this fallback path), so the returned value is that single
    # normalized row broadcast over batch.  The patch-embed matmul does not
    # feed the output; callers needing patch tokens use patch_embed().
    B = x.shape[0]
    cls = cls_ln_call(packed["cls_pos0"], packed["gamma"], packed["beta"])  # (1, D)
    return jnp.broadcast_to(cls, (B, EMBED_DIM))                            # (B, D)


# --------------------------------- references ----------------------------------
def reference_forward(x, params):
    # Pure-JAX f32 mirror of the full PyTorch fallback forward.
    B = x.shape[0]
    patches = im2col(x)
    w = params["patch_w"].reshape(EMBED_DIM, K_DIM).T
    emb = patches @ w + params["patch_b"]
    cls = jnp.broadcast_to(params["cls_token"], (B, 1, EMBED_DIM))
    tokens = jnp.concatenate([cls, emb], axis=1) + params["pos_embed"]
    mean = tokens.mean(-1, keepdims=True)
    var = ((tokens - mean) ** 2).mean(-1, keepdims=True)
    normed = (tokens - mean) * jax.lax.rsqrt(var + LN_EPS)
    normed = normed * params["ln_gamma"] + params["ln_beta"]
    return normed[:, 0, :]


def reference_patch_embed(x, params):
    # bf16-input / f32-accumulate reference matching the kernel's MXU dtypes.
    patches = im2col(x).astype(jnp.bfloat16).astype(jnp.float32)
    w = params["patch_w"].reshape(EMBED_DIM, K_DIM).T
    w = w.astype(jnp.bfloat16).astype(jnp.float32)
    return jnp.einsum("bpk,kd->bpd", patches, w) + params["patch_b"]


if __name__ == "__main__":
    key = jax.random.PRNGKey(0)
    kx, kp = jax.random.split(key)
    x = jax.random.normal(kx, (BATCH, CHANNELS, IMG, IMG), jnp.float32)
    params = init_params(kp)
    packed = pack_params(params)

    # Module output (CLS token features).
    out = jax.block_until_ready(dinov2_backbone_forward(x, packed))
    assert out.shape == (BATCH, EMBED_DIM), out.shape
    ref = reference_forward(x, params)
    np.testing.assert_allclose(np.asarray(out), np.asarray(ref), rtol=1e-4, atol=1e-4)

    # Validate the optimized patch-embed kernel too (the module's returned CLS
    # token does not consume it, but it is the Conv2d translation).
    emb = jax.block_until_ready(patch_embed(x, packed))
    emb_ref = reference_patch_embed(x, params)
    np.testing.assert_allclose(np.asarray(emb), np.asarray(emb_ref), rtol=1e-3, atol=1e-3)

    print("KERNEL_OK")
</pallas_src>

<mosaic_0001>
module attributes {stable_mosaic.version = 11 : i64} {
  func.func @cls_ln_kernel(%arg0: i32, %arg1: memref<1x128xf32, #tpu.memory_space<vmem>>, %arg2: memref<1x128xf32, #tpu.memory_space<vmem>>, %arg3: memref<1x128xf32, #tpu.memory_space<vmem>>, %arg4: memref<1x128xf32, #tpu.memory_space<vmem>>) attributes {dimension_semantics = [#tpu.dimension_semantics<arbitrary>], iteration_bounds = array<i64: 1>, scalar_prefetch = 0 : i64, scratch_operands = 0 : i64, tpu.core_type = #tpu.core_type<tc>, window_params = [{pipeline_mode = #tpu.pipeline_mode<synchronous>, transform_indices = @transform_0, window_bounds = array<i64: 1, 128>}, {pipeline_mode = #tpu.pipeline_mode<synchronous>, transform_indices = @transform_1, window_bounds = array<i64: 1, 128>}, {pipeline_mode = #tpu.pipeline_mode<synchronous>, transform_indices = @transform_2, window_bounds = array<i64: 1, 128>}, {pipeline_mode = #tpu.pipeline_mode<synchronous>, transform_indices = @transform_3, window_bounds = array<i64: 1, 128>}]} {
    %c0 = arith.constant 0 : index
    %c0_0 = arith.constant 0 : index
    %0 = vector.load %arg1[%c0, %c0_0] : memref<1x128xf32, #tpu.memory_space<vmem>>, vector<1x128xf32>
    %cst = arith.constant dense<0.000000e+00> : vector<1xf32>
    %1 = vector.multi_reduction <add>, %0, %cst [1] : vector<1x128xf32> to vector<1xf32>
    %2 = vector.shape_cast %1 : vector<1xf32> to vector<1x1xf32>
    %cst_1 = arith.constant 1.280000e+02 : f32
    %3 = vector.broadcast %cst_1 : f32 to vector<1x1xf32>
    %4 = arith.divf %2, %3 : vector<1x1xf32>
    %5 = vector.broadcast %4 : vector<1x1xf32> to vector<1x128xf32>
    %6 = arith.subf %0, %5 : vector<1x128xf32>
    %7 = arith.mulf %6, %6 : vector<1x128xf32>
    %cst_2 = arith.constant dense<0.000000e+00> : vector<1xf32>
    %8 = vector.multi_reduction <add>, %7, %cst_2 [1] : vector<1x128xf32> to vector<1xf32>
    %9 = vector.shape_cast %8 : vector<1xf32> to vector<1x1xf32>
    %cst_3 = arith.constant 1.280000e+02 : f32
    %10 = vector.broadcast %cst_3 : f32 to vector<1x1xf32>
    %11 = arith.divf %9, %10 : vector<1x1xf32>
    %cst_4 = arith.constant 9.99999974E-6 : f32
    %12 = vector.broadcast %cst_4 : f32 to vector<1x1xf32>
    %13 = arith.addf %11, %12 : vector<1x1xf32>
    %14 = math.rsqrt %13 : vector<1x1xf32>
    %15 = vector.broadcast %14 : vector<1x1xf32> to vector<1x128xf32>
    %16 = arith.mulf %6, %15 : vector<1x128xf32>
    %c0_5 = arith.constant 0 : index
    %c0_6 = arith.constant 0 : index
    %17 = vector.load %arg2[%c0_5, %c0_6] : memref<1x128xf32, #tpu.memory_space<vmem>>, vector<1x128xf32>
    %18 = arith.mulf %16, %17 : vector<1x128xf32>
    %c0_7 = arith.constant 0 : index
    %c0_8 = arith.constant 0 : index
    %19 = vector.load %arg3[%c0_7, %c0_8] : memref<1x128xf32, #tpu.memory_space<vmem>>, vector<1x128xf32>
    %20 = arith.addf %18, %19 : vector<1x128xf32>
    %c0_9 = arith.constant 0 : index
    %c0_10 = arith.constant 0 : index
    %21 = vector.load %arg4[%c0_9, %c0_10] : memref<1x128xf32, #tpu.memory_space<vmem>>, vector<1x128xf32>
    tpu.vector_store %arg4[%c0_9, %c0_10], %20 {strides = array<i32>} : memref<1x128xf32, #tpu.memory_space<vmem>>, vector<1x128xf32>,
    return
  }
  func.func @transform_0(%arg0: i32) -> (i32, i32) {
    %c0_i32 = arith.constant 0 : i32
    %c0_i32_0 = arith.constant 0 : i32
    %c0_i32_1 = arith.constant 0 : i32
    return %c0_i32, %c0_i32_0 : i32, i32
  }
  func.func @transform_1(%arg0: i32) -> (i32, i32) {
    %c0_i32 = arith.constant 0 : i32
    %c0_i32_0 = arith.constant 0 : i32
    %c0_i32_1 = arith.constant 0 : i32
    return %c0_i32, %c0_i32_0 : i32, i32
  }
  func.func @transform_2(%arg0: i32) -> (i32, i32) {
    %c0_i32 = arith.constant 0 : i32
    %c0_i32_0 = arith.constant 0 : i32
    %c0_i32_1 = arith.constant 0 : i32
    return %c0_i32, %c0_i32_0 : i32, i32
  }
  func.func @transform_3(%arg0: i32) -> (i32, i32) {
    %c0_i32 = arith.constant 0 : i32
    %c0_i32_0 = arith.constant 0 : i32
    %c0_i32_1 = arith.constant 0 : i32
    return %c0_i32, %c0_i32_0 : i32, i32
  }
}

</mosaic_0001>

<bundles_post_ra>
// kernel: tpu_custom_call.1
= control target key start
LH: loop header
LB: loop body
LE: loop exit
PB: predicated region body
PF: predicated region fallthrough
CT: control target
= control target key end

     0   :  { %8 = vsyncpa [#allocation3], 0  ;;  %s167_s0 = inlined_call_operand.hbm [shape: f32[1,128], index: 0, kind: input, shape index: {}]   ;;  %s168_s1 = inlined_call_operand.vmem [shape: f32[1,128], index: 1, kind: input, shape index: {}]   ;;  %s169_s2 = inlined_call_operand.vmem [shape: f32[1,128], index: 2, kind: input, shape index: {}]   ;;  %s170_s3 = inlined_call_operand.hbm [shape: f32[1,128], index: 3, kind: output, shape index: {}]  }
   0x1   :  { %9 = vsyncpa [#allocation4], 0  ;;  %s115_s12 = smov [#allocation2]   ;;  %s67_s16 = scalar_lea.hbm %s167_s0, 16 }
   0x2   :  { %s16_s13 = sshll.u32 %s115_s12, 4  ;;  %p68_p0 = scmp.ne.s32.totalorder %s167_s0, %s67_s16  ;;  %s17_s13 = int_to_ptr.vmem [resolvable:$true] %s16_s13 }
   0x3   :  { %p71_p1 = scmp.lt.u32.totalorder %s67_s16, %s167_s0 }
   0x5   :  { %p73_p2 = pnand %p71_p1, %p68_p0 }
   0x7   :  { %76 = shalt.err (!%p73_p2)
}
   0x8   :  { %s77_s21 = scalar_lea.vmem %s17_s13, 16  ;;  %s81_s22 = scalar_lea.vmem %s17_s13, 32 }
   0x9   :  { %p78_p3 = scmp.ne.s32.totalorder %s17_s13, %s77_s21  ;;  %p82_p4 = scmp.lt.s32.totalorder %s17_s13, %s17_s13 }
   0xa   :  { %p83_p5 = scmp.lt.s32.totalorder %s81_s22, %s77_s21 }
   0xc   :  { %p84_p6 = por %p83_p5, %p82_p4 }
   0xe   :  { %p85_p7 = pnand %p84_p6, %p78_p3 }
  0x10   :  { %88 = shalt.err (!%p85_p7)
}
  0x11   :  { %19 = dma.hbm_to_vmem [thread:$0]  %s167_s0, 16, %s17_s13, [#allocation3]  }
  0x12   :  { %111 = dma.done.wait [#allocation3], 16  }
  0x13   :  { %112 = vsyncadd [#allocation3], 4294967280  ;;  %vm28_vm0 = vcmask 1040384   ;;  %v27_v0 = vld [vmem:[#allocation2] sm:$0x1]  ;;  %s116_s28 = smov [#allocation5]  }
  0x14   :  { %v29_v1 = vsel %vm28_vm0, %v27_v0, 0.0  ;;  %v43_v11 = vld [vmem:[%s168_s1] sm:$0x1]  ;;  %s54_s29 = sshll.u32 %s116_s28, 4  ;;  %s55_s29 = int_to_ptr.vmem [resolvable:$true] %s54_s29 }
  0x15   :  { %30 = vadd.xlane.f32.xlu0 %v29_v1  ;;  %v45_v13 = vld [vmem:[%s169_s2] sm:$0x1]  ;;  %s89_s30 = scalar_lea.vmem %s55_s29, 16  ;;  %s93_s4 = scalar_lea.vmem %s55_s29, 32 }
  0x16   :  { %p90_p8 = scmp.ne.s32.totalorder %s55_s29, %s89_s30  ;;  %p94_p9 = scmp.lt.s32.totalorder %s55_s29, %s55_s29 }
  0x17   :  { %p95_p10 = scmp.lt.s32.totalorder %s93_s4, %s89_s30 }
  0x19   :  { %p96_p11 = por %p95_p10, %p94_p9 }
  0x1b   :  { %p97_p12 = pnand %p96_p11, %p90_p8 }
  0xa2   :  { %v31_v2 = vpop.xlane.xlu0 %30 }
  0xa3   :  { %v33_v3 = vmul.f32 0.0078125, %v31_v2 }
  0xa5   :  { %v34_v4 = vsub.f32 %v27_v0, %v33_v3 }
  0xa7   :  { %v35_v5 = vmul.f32 %v34_v4, %v34_v4 }
  0xa9   :  { %v36_v6 = vsel %vm28_vm0, %v35_v5, 0.0 }
  0xaa   :  { %37 = vadd.xlane.f32.xlu0 %v36_v6 }
 0x137   :  { %v38_v7 = vpop.xlane.xlu0 %37 }
 0x138   :  { %v39_v8 = vmul.f32 0.0078125, %v38_v7 }
 0x13a   :  { %v40_v9 = vadd.f32 1e-05, %v39_v8 }
 0x13c   :  { %65 = vrsqrt.f32 %v40_v9 }
 0x146   :  { %v66_v10 = vpop.eup %65 }
 0x147   :  { %v42_v12 = vmul.f32 %v66_v10, %v34_v4 }
 0x149   :  { %v44_v14 = vmul.f32 %v43_v11, %v42_v12 }
 0x14b   :  { %v46_v15 = vadd.f32 %v45_v13, %v44_v14 }
 0x14d   :  { %47 = vst [vmem:[#allocation5] sm:$0x1] %v46_v15 }
 0x14e   :  { %100 = shalt.err (!%p97_p12)
}
 0x14f   :  { %s101_s6 = scalar_lea.hbm %s170_s3, 16 }
 0x150   :  { %p102_p13 = scmp.ne.s32.totalorder %s170_s3, %s101_s6  ;;  %p105_p0 = scmp.lt.u32.totalorder %s101_s6, %s170_s3 }
 0x152   :  { %p107_p1 = pnand %p105_p0, %p102_p13 }
 0x154   :  { %110 = shalt.err (!%p107_p1)
}
 0x155   :  { %57 = dma.vmem_to_hbm [thread:$0]  %s55_s29, 16, %s170_s3, [#allocation4]  }
 0x156   :  { %113 = dma.done.wait [#allocation4], 16  }
 0x157   :  { %114 = vsyncadd [#allocation4], 4294967280 }
 0x158   :  { %61 = vsyncpa [#allocation3], 1 }
 0x159   :  { %62 = vsyncpa [#allocation4], 1 }

</bundles_post_ra>
